<compile_context>
chip_gen: v6e
topology: v6e:2x2x1
jax: 0.10.0
libtpu: 0.0.40
codegen_flags: <defaults>
</compile_context>

<pallas_src>
import functools

import jax
import jax.numpy as jnp
from jax import lax
from jax.experimental import pallas as pl
from jax.experimental.pallas import tpu as pltpu

_MB = 1024 * 1024


def _vmem_capacity_bytes() -> int:
    """Physical per-core VMEM, with a conservative fallback (v7x size)."""
    try:
        return int(pltpu.get_tpu_info().vmem_capacity_bytes)
    except Exception:  # query unavailable in some environments
        return 64 * _MB


def _nce_loss_from_logits(logit_pos, logit_neg):
    """CrossEntropy(cat([pos, neg]), target=0, 'none') = logsumexp(., -1) - pos."""
    m = jnp.maximum(logit_pos, jnp.max(logit_neg, axis=-1, keepdims=True))
    sum_exp = jnp.exp(logit_pos - m) + jnp.sum(
        jnp.exp(logit_neg - m), axis=-1, keepdims=True
    )
    return m + jnp.log(sum_exp) - logit_pos


def _patch_nce_rowtile_kernel(q_ref, k_ref, out_ref, *, nce_T: float):
    """One (batch b, row-tile i) grid step (large-P path).

    q_ref  : (1, tq, D)  query rows of this tile (native dtype)
    k_ref  : (1, P,  D)  all keys of batch element b (resident across row tiles)
    out_ref: (1, tq, 1)  per-row loss (column layout: no sublane->lane transpose)
    """
    i = pl.program_id(1)
    tq = q_ref.shape[1]
    P = k_ref.shape[1]
    row0 = pl.multiple_of(i * tq, tq)

    q = q_ref[0]                                   # (tq, D)
    k = k_ref[0]                                   # (P, D)

    # Negatives: S = q . k^T on the MXU with f32 accumulation (no explicit transpose).
    s = lax.dot_general(
        q, k,
        dimension_numbers=(((1,), (1,)), ((), ())),
        preferred_element_type=jnp.float32,
    )                                              # (tq, P) f32

    # Positives: the paired keys are rows [row0, row0+tq) of the already-resident k
    # block -- sliced in VMEM, no second k stream from HBM.
    k_pair = k_ref[0, pl.ds(row0, tq), :]          # (tq, D)
    l_pos = jnp.sum(
        q.astype(jnp.float32) * k_pair.astype(jnp.float32),
        axis=-1, keepdims=True,
    )                                              # (tq, 1) f32

    inv_T = jnp.float32(1.0 / nce_T)
    masked = jnp.float32(-10.0) * inv_T
    # TODO(synk): restrict the diagonal mask to the (tq, tq) window at column row0
    # (value-level dynamic lane slicing) for very large P; the full (tq, P) select is
    # exact and small relative to the HBM-bound matmul in typical configs.
    rows = lax.broadcasted_iota(jnp.int32, (tq, P), 0) + row0
    cols = lax.broadcasted_iota(jnp.int32, (tq, P), 1)
    logit_neg = jnp.where(rows == cols, masked, s * inv_T)     # (tq, P)
    logit_pos = l_pos * inv_T                                  # (tq, 1)

    out_ref[0] = _nce_loss_from_logits(logit_pos, logit_neg)   # (tq, 1)


def _patch_nce_batched_kernel(q_ref, k_ref, out_ref, *, nce_T: float):
    """One grid step covering Bblk whole batch elements (small-P path).

    q_ref, k_ref : (Bblk, P, D)     out_ref : (Bblk, P, 1)
    """
    q = q_ref[...]
    k = k_ref[...]
    bblk, P, _ = q_ref.shape

    s = jnp.einsum("bqd,bkd->bqk", q, k,
                   preferred_element_type=jnp.float32)         # (Bblk, P, P) f32
    l_pos = jnp.sum(
        q.astype(jnp.float32) * k.astype(jnp.float32),
        axis=-1, keepdims=True,
    )                                                          # (Bblk, P, 1)

    inv_T = jnp.float32(1.0 / nce_T)
    masked = jnp.float32(-10.0) * inv_T
    rows = lax.broadcasted_iota(jnp.int32, (bblk, P, P), 1)
    cols = lax.broadcasted_iota(jnp.int32, (bblk, P, P), 2)
    logit_neg = jnp.where(rows == cols, masked, s * inv_T)     # (Bblk, P, P)
    logit_pos = l_pos * inv_T                                  # (Bblk, P, 1)

    out_ref[...] = _nce_loss_from_logits(logit_pos, logit_neg)


def _pick_row_tile(P: int, D: int, itemsize: int, budget: int) -> int:
    """Row tile for the resident-k path: prefer nt >= 2 for pipelining / megacore."""
    for tq in (512, 256, 128):
        if P % tq != 0 or P // tq < 2:
            continue
        need = (2 * P * D * itemsize          # resident k (double-buffered)
                + 4 * tq * D * itemsize       # q tiles (double-buffered) + k_pair slice
                + 3 * tq * P * 4              # S slab + mask/exp temporaries
                + 4 * tq * 4)
        if need <= budget:
            return tq
    return 128


def _batched_need(bblk: int, P: int, D: int, itemsize: int) -> int:
    return (4 * bblk * P * D * itemsize       # q + k blocks, double-buffered
            + 3 * bblk * P * P * 4            # S + mask/exp temporaries
            + 4 * bblk * P * 4)


def _pick_batch_block(B: int, P: int, D: int, itemsize: int, budget: int) -> int:
    """Largest divisor of B (capped at 8) whose per-step working set fits the budget."""
    best = 1
    for bb in range(1, min(B, 8) + 1):
        if B % bb != 0:
            continue
        if _batched_need(bb, P, D, itemsize) <= budget:
            best = bb
    return best


def patch_nce_loss(
    feat_q,
    feat_k,
    *,
    batch_size: int,
    nce_T: float,
    nce_includes_all_negatives_from_minibatch: bool = False,
):
    """Pallas TPU implementation of PatchNCELoss.forward.

    feat_q, feat_k: [num_patches, dim] float arrays.
    Returns: [num_patches] float32 per-patch loss (reduction='none').
    """
    num_patches, dim = feat_q.shape
    B = 1 if nce_includes_all_negatives_from_minibatch else batch_size
    assert num_patches % B == 0, "num_patches must be divisible by the bmm batch dim"
    P = num_patches // B

    # Native dtype pass-through (bf16 stays bf16 -> half the HBM bytes).  detach().
    q = feat_q.reshape(B, P, dim)
    k = lax.stop_gradient(feat_k).reshape(B, P, dim)
    itemsize = jnp.dtype(q.dtype).itemsize

    vmem_cap = _vmem_capacity_bytes()
    vmem_ceiling = int(vmem_cap * 0.78)   # headroom for Mosaic internal scratch
    choose_budget = int(vmem_cap * 0.55)  # budget used when picking tile sizes

    cost = pl.CostEstimate(
        flops=int(2 * num_patches * P * dim + 2 * num_patches * dim
                  + 8 * num_patches * P),
        transcendentals=int(num_patches * (P + 1)),
        bytes_accessed=int(2 * num_patches * dim * itemsize + 4 * num_patches),
    )

    use_row_tiled = (P > 512) and (P % 128 == 0)

    if use_row_tiled:
        tq = _pick_row_tile(P, dim, itemsize, choose_budget)
        nt = P // tq
        need = (2 * P * dim * itemsize + 4 * tq * dim * itemsize
                + 3 * tq * P * 4 + 4 * tq * 4 + 4 * _MB)
        # TODO(synk): all-negatives mode with very large P*D should switch to an
        # online-softmax loop over k tiles instead of a fully resident k block.
        out = pl.pallas_call(
            functools.partial(_patch_nce_rowtile_kernel, nce_T=float(nce_T)),
            out_shape=jax.ShapeDtypeStruct((B, P, 1), jnp.float32),
            grid_spec=pltpu.PrefetchScalarGridSpec(
                num_scalar_prefetch=0,
                grid=(B, nt),
                in_specs=[
                    pl.BlockSpec((1, tq, dim), lambda b, i: (b, i, 0)),  # q row tile
                    # TODO(synk): on v7x, single-buffer this resident block
                    # (pipeline_mode=pl.Buffered(1)) to halve its VMEM footprint.
                    pl.BlockSpec((1, P, dim), lambda b, i: (b, 0, 0)),   # k resident per b
                ],
                out_specs=pl.BlockSpec((1, tq, 1), lambda b, i: (b, i, 0)),
            ),
            compiler_params=pltpu.CompilerParams(
                dimension_semantics=("parallel", "parallel"),
                vmem_limit_bytes=int(min(vmem_ceiling, max(32 * _MB, need))),
            ),
            cost_estimate=cost,
        )(q, k)
    else:
        bblk = _pick_batch_block(B, P, dim, itemsize, choose_budget)
        need = _batched_need(bblk, P, dim, itemsize) + 4 * _MB
        out = pl.pallas_call(
            functools.partial(_patch_nce_batched_kernel, nce_T=float(nce_T)),
            out_shape=jax.ShapeDtypeStruct((B, P, 1), jnp.float32),
            grid_spec=pltpu.PrefetchScalarGridSpec(
                num_scalar_prefetch=0,
                grid=(B // bblk,),
                in_specs=[
                    pl.BlockSpec((bblk, P, dim), lambda b: (b, 0, 0)),   # q blocks
                    pl.BlockSpec((bblk, P, dim), lambda b: (b, 0, 0)),   # k blocks
                ],
                out_specs=pl.BlockSpec((bblk, P, 1), lambda b: (b, 0, 0)),
            ),
            compiler_params=pltpu.CompilerParams(
                dimension_semantics=("parallel",),
                vmem_limit_bytes=int(min(vmem_ceiling, max(32 * _MB, need))),
            ),
            cost_estimate=cost,
        )(q, k)

    return out.reshape(num_patches)


def _reference_patch_nce_loss(feat_q, feat_k, *, batch_size, nce_T,
                              nce_includes_all_negatives_from_minibatch=False):
    """Pure-JAX reference mirroring the PyTorch forward exactly."""
    num_patches, dim = feat_q.shape
    hi = lax.Precision.HIGHEST
    l_pos = jnp.einsum("nd,nd->n", feat_q, feat_k, precision=hi)[:, None]   # (N, 1)
    B = 1 if nce_includes_all_negatives_from_minibatch else batch_size
    q = feat_q.reshape(B, -1, dim)
    k = feat_k.reshape(B, -1, dim)
    P = q.shape[1]
    l_neg = jnp.einsum("bpd,bqd->bpq", q, k, precision=hi)                  # (B, P, P)
    eye = jnp.eye(P, dtype=bool)[None]
    l_neg = jnp.where(eye, -10.0, l_neg).reshape(-1, P)                     # (N, P)
    out = jnp.concatenate([l_pos, l_neg], axis=1) / nce_T                   # (N, P+1)
    return jax.nn.logsumexp(out, axis=1) - out[:, 0]                        # CE, target 0


if __name__ == "__main__":
    batch_size = 2
    dim = 32
    nce_T = 0.07

    def _make_feats(key, num_patches, dim):
        kq, kk = jax.random.split(key)
        fq = jax.random.normal(kq, (num_patches, dim), dtype=jnp.float32)
        fk = jax.random.normal(kk, (num_patches, dim), dtype=jnp.float32)
        # PatchNCE features are L2-normalized in practice.
        fq = fq / jnp.linalg.norm(fq, axis=-1, keepdims=True)
        fk = fk / jnp.linalg.norm(fk, axis=-1, keepdims=True)
        return fq, fk

    key = jax.random.PRNGKey(0)
    k1, k2 = jax.random.split(key)

    # Case 1: small P -> batched-per-step path (the common PatchNCE regime).
    n1 = batch_size * 8
    fq1, fk1 = _make_feats(k1, n1, dim)
    loss1 = jax.block_until_ready(
        patch_nce_loss(fq1, fk1, batch_size=batch_size, nce_T=nce_T))
    ref1 = _reference_patch_nce_loss(fq1, fk1, batch_size=batch_size, nce_T=nce_T)
    assert loss1.shape == (n1,)
    assert jnp.allclose(loss1, ref1, atol=1e-4, rtol=1e-4), \
        float(jnp.max(jnp.abs(loss1 - ref1)))

    # Case 2: larger P -> row-tiled path with resident k (dynamic paired-key slice).
    n2 = batch_size * 640
    fq2, fk2 = _make_feats(k2, n2, dim)
    loss2 = jax.block_until_ready(
        patch_nce_loss(fq2, fk2, batch_size=batch_size, nce_T=nce_T))
    ref2 = _reference_patch_nce_loss(fq2, fk2, batch_size=batch_size, nce_T=nce_T)
    assert loss2.shape == (n2,)
    assert jnp.allclose(loss2, ref2, atol=1e-4, rtol=1e-4), \
        float(jnp.max(jnp.abs(loss2 - ref2)))

    print("KERNEL_OK")
</pallas_src>

<mosaic_0001>
module attributes {stable_mosaic.version = 11 : i64} {
  func.func @_patch_nce_batched_kernel(%arg0: i32, %arg1: memref<2x8x32xf32, #tpu.memory_space<vmem>>, %arg2: memref<2x8x32xf32, #tpu.memory_space<vmem>>, %arg3: memref<2x8x1xf32, #tpu.memory_space<vmem>>) attributes {dimension_semantics = [#tpu.dimension_semantics<parallel>], iteration_bounds = array<i64: 1>, scalar_prefetch = 0 : i64, scratch_operands = 0 : i64, tpu.core_type = #tpu.core_type<tc>, window_params = [{transform_indices = @transform_0, window_bounds = array<i64: 2, 8, 32>}, {transform_indices = @transform_1, window_bounds = array<i64: 2, 8, 32>}, {transform_indices = @transform_2, window_bounds = array<i64: 2, 8, 1>}]} {
    %c0 = arith.constant 0 : index
    %c0_0 = arith.constant 0 : index
    %c0_1 = arith.constant 0 : index
    %0 = vector.load %arg1[%c0, %c0_0, %c0_1] : memref<2x8x32xf32, #tpu.memory_space<vmem>>, vector<2x8x32xf32>
    %c0_2 = arith.constant 0 : index
    %c0_3 = arith.constant 0 : index
    %c0_4 = arith.constant 0 : index
    %1 = vector.load %arg2[%c0_2, %c0_3, %c0_4] : memref<2x8x32xf32, #tpu.memory_space<vmem>>, vector<2x8x32xf32>
    "tpu.trace_start"() <{level = 10 : i32, message = "bqd,bkd->bqk"}> : () -> ()
    %cst = arith.constant dense<0.000000e+00> : vector<2x8x8xf32>
    %2 = tpu.matmul %0, %1, %cst {dimension_numbers = #tpu.dot_dimension_numbers<[2], [2], [1], [1], [0, 0, 0, 1, 1, 1], [0], [0]>} : vector<2x8x32xf32>, vector<2x8x32xf32>, vector<2x8x8xf32> -> vector<2x8x8xf32>
    "tpu.trace_stop"() : () -> ()
    %3 = arith.mulf %0, %1 : vector<2x8x32xf32>
    %cst_5 = arith.constant dense<0.000000e+00> : vector<2x8xf32>
    %4 = vector.multi_reduction <add>, %3, %cst_5 [2] : vector<2x8x32xf32> to vector<2x8xf32>
    %5 = vector.shape_cast %4 : vector<2x8xf32> to vector<2x8x1xf32>
    %cst_6 = arith.constant -1.000000e+01 : f32
    %cst_7 = arith.constant 14.2857141 : f32
    %6 = arith.mulf %cst_6, %cst_7 : f32
    %7 = tpu.iota {dimensions = array<i32: 1>} : vector<2x8x8xi32>
    %8 = tpu.iota {dimensions = array<i32: 2>} : vector<2x8x8xi32>
    %9 = arith.cmpi eq, %7, %8 : vector<2x8x8xi32>
    %cst_8 = arith.constant 14.2857141 : f32
    %10 = vector.broadcast %cst_8 : f32 to vector<2x8x8xf32>
    %11 = arith.mulf %2, %10 : vector<2x8x8xf32>
    %12 = vector.broadcast %6 : f32 to vector<2x8x8xf32>
    %13 = arith.select %9, %12, %11 : vector<2x8x8xi1>, vector<2x8x8xf32>
    %cst_9 = arith.constant 14.2857141 : f32
    %14 = vector.broadcast %cst_9 : f32 to vector<2x8x1xf32>
    %15 = arith.mulf %5, %14 : vector<2x8x1xf32>
    %cst_10 = arith.constant dense<0xFF800000> : vector<2x8xf32>
    %16 = vector.multi_reduction <maximumf>, %13, %cst_10 [2] : vector<2x8x8xf32> to vector<2x8xf32>
    %17 = vector.shape_cast %16 : vector<2x8xf32> to vector<2x8x1xf32>
    %18 = arith.maximumf %15, %17 : vector<2x8x1xf32>
    %19 = arith.subf %15, %18 : vector<2x8x1xf32>
    %20 = math.exp %19 : vector<2x8x1xf32>
    %21 = vector.broadcast %18 : vector<2x8x1xf32> to vector<2x8x8xf32>
    %22 = arith.subf %13, %21 : vector<2x8x8xf32>
    %23 = math.exp %22 : vector<2x8x8xf32>
    %cst_11 = arith.constant dense<0.000000e+00> : vector<2x8xf32>
    %24 = vector.multi_reduction <add>, %23, %cst_11 [2] : vector<2x8x8xf32> to vector<2x8xf32>
    %25 = vector.shape_cast %24 : vector<2x8xf32> to vector<2x8x1xf32>
    %26 = arith.addf %20, %25 : vector<2x8x1xf32>
    %27 = math.log %26 : vector<2x8x1xf32>
    %28 = arith.addf %18, %27 : vector<2x8x1xf32>
    %29 = arith.subf %28, %15 : vector<2x8x1xf32>
    %c0_12 = arith.constant 0 : index
    %c0_13 = arith.constant 0 : index
    %c0_14 = arith.constant 0 : index
    %30 = vector.load %arg3[%c0_12, %c0_13, %c0_14] : memref<2x8x1xf32, #tpu.memory_space<vmem>>, vector<2x8x1xf32>
    tpu.vector_store %arg3[%c0_12, %c0_13, %c0_14], %29 {strides = array<i32>} : memref<2x8x1xf32, #tpu.memory_space<vmem>>, vector<2x8x1xf32>,
    return
  }
  func.func @transform_0(%arg0: i32) -> (i32, i32, i32) {
    %c0_i32 = arith.constant 0 : i32
    %c0_i32_0 = arith.constant 0 : i32
    %c0_i32_1 = arith.constant 0 : i32
    return %arg0, %c0_i32, %c0_i32_0 : i32, i32, i32
  }
  func.func @transform_1(%arg0: i32) -> (i32, i32, i32) {
    %c0_i32 = arith.constant 0 : i32
    %c0_i32_0 = arith.constant 0 : i32
    %c0_i32_1 = arith.constant 0 : i32
    return %arg0, %c0_i32, %c0_i32_0 : i32, i32, i32
  }
  func.func @transform_2(%arg0: i32) -> (i32, i32, i32) {
    %c0_i32 = arith.constant 0 : i32
    %c0_i32_0 = arith.constant 0 : i32
    %c0_i32_1 = arith.constant 0 : i32
    return %arg0, %c0_i32, %c0_i32_0 : i32, i32, i32
  }
}

</mosaic_0001>

<bundles_post_ra>
// kernel: tpu_custom_call.1
= control target key start
LH: loop header
LB: loop body
LE: loop exit
PB: predicated region body
PF: predicated region fallthrough
CT: control target
= control target key end

     0   :  { %7 = vsyncpa [#allocation3], 0  ;;  %s378_s0 = inlined_call_operand.hbm [shape: f32[2,8,32], index: 0, kind: input, shape index: {}]   ;;  %s379_s1 = inlined_call_operand.hbm [shape: f32[2,8,32], index: 1, kind: input, shape index: {}]   ;;  %s380_s2 = inlined_call_operand.vmem [shape: f32[2,8,1], index: 2, kind: output, shape index: {}]  }
   0x1   :  { %8 = vsyncpa [#allocation5], 0  ;;  %s341_s9 = smov [#allocation2]  }
   0x2   :  { %s14_s10 = sshll.u32 %s341_s9, 4  ;;  %s15_s10 = int_to_ptr.vmem [resolvable:$true] %s14_s10 }
   0x3   :  { %s305_s11 = scalar_lea.vmem %s15_s10, 256  ;;  %p310_p1 = scmp.lt.s32.totalorder %s15_s10, %s15_s10 }
   0x4   :  { %p306_p0 = scmp.ne.s32.totalorder %s15_s10, %s305_s11  ;;  %p311_p2 = scmp.lt.s32.totalorder %s305_s11, %s305_s11 }
   0x6   :  { %p312_p3 = por %p311_p2, %p310_p1 }
   0x8   :  { %p313_p4 = pnand %p312_p3, %p306_p0 }
   0xa   :  { %316 = shalt.err (!%p313_p4)
}
   0xb   :  { %s342_s12 = smov 128   ;;  %s343_s13 = smov 8  }
   0xc   :  { %20 = dma.hbm_to_vmem [thread:$0]  %s378_s0, 256, %s15_s10, [#allocation3], %s342_s12, %s342_s12, %s343_s13  }
   0xd   :  { %s344_s16 = smov [#allocation4]  }
   0xe   :  { %s26_s17 = sshll.u32 %s344_s16, 4  ;;  %s27_s17 = int_to_ptr.vmem [resolvable:$true] %s26_s17 }
   0xf   :  { %s325_s18 = scalar_lea.vmem %s27_s17, 256  ;;  %p330_p6 = scmp.lt.s32.totalorder %s27_s17, %s27_s17 }
  0x10   :  { %p326_p5 = scmp.ne.s32.totalorder %s27_s17, %s325_s18  ;;  %p331_p7 = scmp.lt.s32.totalorder %s325_s18, %s325_s18 }
  0x12   :  { %p332_p8 = por %p331_p7, %p330_p6 }
  0x14   :  { %p333_p9 = pnand %p332_p8, %p326_p5 }
  0x16   :  { %336 = shalt.err (!%p333_p9)
}
  0x17   :  { %32 = dma.hbm_to_vmem [thread:$0]  %s379_s1, 256, %s27_s17, [#allocation5], %s342_s12, %s342_s12, %s343_s13  }
  0x18   :  { %337 = dma.done.wait [#allocation3], 256  }
  0x19   :  { %338 = vsyncadd [#allocation3], 4294967040 }
  0x1a   :  { %339 = dma.done.wait [#allocation5], 256  }
  0x1b   :  { %340 = vsyncadd [#allocation5], 4294967040  ;;  %v345_v0 = vmov 0.0   ;;  %vm346_vm0 = vmmov 0   ;;  %vm43_vm1 = vcmask 261120   ;;  %v41_v1 = vld [vmem:[#allocation4] sm:$0xff]  ;;  %v204_v9 = vlaneseq }
  0x1c   :  { %269 = vmatprep.subr.mxu0 %v345_v0  ;;  %274 = vmatprep.subr.mxu1 %v345_v0  ;;  %v42_v2 = vld [vmem:[#allocation4 + $0x8] sm:$0xff]  ;;  %v39_v3 = vld [vmem:[#allocation2] sm:$0xff]  ;;  %v40_v4 = vld [vmem:[#allocation2 + $0x8] sm:$0xff]  ;;  %vm215_vm3 = vcmask 64512   ;;  %vm252_vm4 = vcmask 7168  }
  0x1d   :  { %271 = vmatprep.mubr.msk.f32.mxu0 %vm346_vm0, %v345_v0  ;;  %276 = vmatprep.mubr.msk.f32.mxu1 %vm346_vm0, %v345_v0  ;;  %v196_v5 = vmul.f32 %v41_v1, %v39_v3  ;;  %v197_v7 = vmul.f32 %v42_v2, %v40_v4  ;;  %v205_v10 = vshrl.u32 %v204_v9, 7  ;;  %v207_v11 = vand.u32 127, %v204_v9 }
  0x1e   :  { %270 = vmatpush3.xpose.msk.msra.mxu0 %vm43_vm1, %v41_v1  ;;  %275 = vmatpush3.xpose.msk.msra.mxu1 %vm43_vm1, %v42_v2 }
  0x1f   :  { %v198_v6 = vsel %vm43_vm1, %v196_v5, 0.0  ;;  %v201_v8 = vsel %vm43_vm1, %v197_v7, 0.0  ;;  %vm208_vm2 = vcmp.eq.s32.totalorder %v205_v10, %v207_v11 }
  0x20   :  { %199 = vadd.xlane.f32.xlu0 %v198_v6 }
  0x21   :  { %272 = vmatmul.mubr.msk.f32.vlgmr.msra.gmra.mxu0 %vm43_vm1, %v39_v3  ;;  %277 = vmatmul.mubr.msk.f32.vlgmr.msra.gmra.mxu1 %vm43_vm1, %v40_v4 }
  0x24   :  { %202 = vadd.xlane.f32.xlu0 %v201_v8 }
  0xa9   :  { %v200_v22 = vpop.xlane.xlu0 %199 }
  0xaa   :  { %v213_v23 = vmul.f32 14.285714, %v200_v22 }
  0xad   :  { %v203_v24 = vpop.xlane.xlu0 %202 }
  0xae   :  { %v214_v27 = vmul.f32 14.285714, %v203_v24 }
  0xe1   :  { %v116_v12 = vpop.f32.mrf.mxu0  ;;  %v192_v13 = vpop.f32.mrf.mxu1 }
  0xe2   :  { %v209_v14 = vmul.f32 14.285714, %v116_v12  ;;  %v210_v15 = vmul.f32 14.285714, %v192_v13 }
  0xe3   :  { %v273_v16 = vpop.f32.mrf.mxu0  ;;  %v278_v17 = vpop.f32.mrf.mxu1 }
  0xe4   :  { %v211_v18 = vsel %vm208_vm2, -142.85715, %v209_v14  ;;  %v212_v19 = vsel %vm208_vm2, -142.85715, %v210_v15 }
  0xe5   :  { %v216_v20 = vsel %vm215_vm3, %v211_v18, -inf  ;;  %v219_v21 = vsel %vm215_vm3, %v212_v19, -inf }
  0xe6   :  { %217 = vmax.xlane.f32.xlu1 %v216_v20 }
  0xea   :  { %220 = vmax.xlane.f32.xlu1 %v219_v21 }
 0x16f   :  { %v218_v25 = vpop.xlane.xlu1 %217 }
 0x170   :  { %v222_v26 = vmax.f32 %v213_v23, %v218_v25 }
 0x172   :  { %v230_v28 = vsub.f32 %v211_v18, %v222_v26  ;;  %v224_v38 = vsub.f32 %v213_v23, %v222_v26 }
 0x173   :  { %v221_v29 = vpop.xlane.xlu1 %220 }
 0x174   :  { %v232_v30 = vmul.f32 1.442695, %v230_v28  ;;  %v223_v31 = vmax.f32 %v214_v27, %v221_v29  ;;  %v226_v39 = vmul.f32 1.442695, %v224_v38 }
 0x176   :  { %v231_v32 = vsub.f32 %v212_v19, %v223_v31  ;;  %285 = vpow2.f32 %v232_v30  ;;  %v225_v40 = vsub.f32 %v214_v27, %v223_v31 }
 0x178   :  { %v234_v33 = vmul.f32 1.442695, %v231_v32  ;;  %v228_v41 = vmul.f32 1.442695, %v225_v40 }
 0x17a   :  { %287 = vpow2.f32 %v234_v33 }
 0x17b   :  { %289 = vpow2.f32 %v226_v39 }
 0x17c   :  { %291 = vpow2.f32 %v228_v41 }
 0x183   :  { %v286_v34 = vpop.eup %285 }
 0x184   :  { %v236_v35 = vsel %vm215_vm3, %v286_v34, 0.0 }
 0x185   :  { %237 = vadd.xlane.f32.xlu0 %v236_v35 }
 0x187   :  { %v288_v36 = vpop.eup %287 }
 0x188   :  { %v239_v37 = vsel %vm215_vm3, %v288_v36, 0.0  ;;  %v290_v42 = vpop.eup %289 }
 0x189   :  { %240 = vadd.xlane.f32.xlu1 %v239_v37  ;;  %v292_v45 = vpop.eup %291 }
 0x20e   :  { %v238_v43 = vpop.xlane.xlu0 %237 }
 0x20f   :  { %v242_v44 = vadd.f32 %v290_v42, %v238_v43 }
 0x211   :  { %293 = vlog2.f32 %v242_v44 }
 0x212   :  { %v241_v46 = vpop.xlane.xlu1 %240 }
 0x213   :  { %v243_v47 = vadd.f32 %v292_v45, %v241_v46 }
 0x215   :  { %295 = vlog2.f32 %v243_v47 }
 0x21e   :  { %v294_v48 = vpop.eup %293 }
 0x21f   :  { %v245_v49 = vmul.f32 0.6931472, %v294_v48 }
 0x221   :  { %v248_v50 = vadd.f32 %v245_v49, %v222_v26 }
 0x222   :  { %v296_v51 = vpop.eup %295 }
 0x223   :  { %v250_v52 = vsub.f32 %v248_v50, %v213_v23  ;;  %v247_v53 = vmul.f32 0.6931472, %v296_v51 }
 0x225   :  { %253 = vst.msk [vmem:[%s380_s2] sm:$0xff] %vm252_vm4, %v250_v52  ;;  %v249_v54 = vadd.f32 %v247_v53, %v223_v31 }
 0x227   :  { %v251_v55 = vsub.f32 %v249_v54, %v214_v27 }
 0x229   :  { %254 = vst.msk [vmem:[%s380_s2 + $0x8] sm:$0xff] %vm252_vm4, %v251_v55 }
 0x22a   :  { %259 = vsyncpa [#allocation3], 1 }
 0x22b   :  { %260 = vsyncpa [#allocation5], 1 }

</bundles_post_ra>
